<compile_context>
chip_gen: v5e
topology: v5e:2x2
jax: 0.10.0
libtpu: 0.0.40
codegen_flags: <defaults>
</compile_context>

<pallas_src>
import numpy as np
import jax
import jax.numpy as jnp
from jax.experimental import pallas as pl
from jax.experimental.pallas import tpu as pltpu


def intra_agg_kernel(mask_ref, embed_ref, self_ref, inv_ref, w_ref, o_ref,
                     agg_acc):
    """One (relation, B-tile) block; grid axis 2 reduces over U tiles."""
    u = pl.program_id(2)

    @pl.when(u == 0)
    def _():
        agg_acc[...] = jnp.zeros_like(agg_acc)

    # Binary bf16 mask x bf16 neighbor features, f32 accumulation on the MXU.
    agg_acc[...] += jnp.dot(mask_ref[0], embed_ref[0],
                            preferred_element_type=jnp.float32)

    @pl.when(u == pl.num_programs(2) - 1)
    def _():
        # Exact mean normalization: binary-mask matmul scaled by f32 1/count.
        agg = (agg_acc[...] * inv_ref[0]).astype(jnp.bfloat16)       # (tb, Fp)
        # Folded concat -> single K = 2*Fp matmul against the packed weight.
        cat = jnp.concatenate([self_ref[...], agg], axis=-1)         # (tb, 2Fp)
        h = jnp.dot(cat, w_ref[0], preferred_element_type=jnp.float32)
        o_ref[0] = jnp.maximum(h, 0.0).astype(o_ref.dtype)


def _round_up(x, m):
    return ((x + m - 1) // m) * m


def _pad_axis(x, axis, target):
    pad = target - x.shape[axis]
    if pad == 0:
        return x
    widths = [(0, 0)] * x.ndim
    widths[axis] = (0, pad)
    return jnp.pad(x, widths)


def intra_agg_forward_batched(masks, embed_matrices, self_feats, weights,
                              out_dtype=jnp.float32):
    """Batched IntraAgg forward over R relations in one pallas_call.

    masks:           (R, B, U)  binary (0/1) neighbor membership
    embed_matrices:  (R, U, F)  neighbor feature rows (zero-padded rows ok)
    self_feats:      (B, F)     shared across relations
    weights:         (R, 2F, E) one weight per relation / IntraAgg
    returns:         (R, B, E)  out_dtype (f32 matches the PyTorch module)
    """
    R, B, U = masks.shape
    F = self_feats.shape[-1]
    E = weights.shape[-1]
    assert embed_matrices.shape == (R, U, F)
    assert weights.shape == (R, 2 * F, E)

    # Static, lane/sublane-aligned buckets: no retrace on small U jitter,
    # lane-dense (128) loads/stores everywhere.
    Fp = _round_up(max(F, 1), 128)
    Ep = _round_up(max(E, 1), 128)
    tb = 256 if B > 256 else _round_up(max(B, 1), 16)      # bf16 sublane tile
    Bp = _round_up(max(B, tb), tb)
    tu = 512 if U > 512 else _round_up(max(U, 1), 128)
    Up = _round_up(max(U, tu), tu)

    # Binary mask is exact in bf16; counts / reciprocals stay f32 on the host.
    masks_f32 = _pad_axis(_pad_axis(masks.astype(jnp.float32), 2, Up), 1, Bp)
    counts = jnp.maximum(jnp.sum(masks_f32, axis=2, keepdims=True), 1.0)
    inv_counts = (1.0 / counts).astype(jnp.float32)          # (R, Bp, 1)
    masks_bf = masks_f32.astype(jnp.bfloat16)

    embeds_p = _pad_axis(_pad_axis(embed_matrices, 2, Fp), 1, Up) \
        .astype(jnp.bfloat16)
    self_p = _pad_axis(_pad_axis(self_feats, 1, Fp), 0, Bp).astype(jnp.bfloat16)

    # Weight packed for the fused concat matmul: rows [0:F] act on self_feats,
    # rows [Fp:Fp+F] act on agg_feats, everything else is exact zero padding.
    w_p = jnp.zeros((R, 2 * Fp, Ep), jnp.bfloat16)
    w_p = w_p.at[:, :F, :E].set(weights[:, :F, :].astype(jnp.bfloat16))
    w_p = w_p.at[:, Fp:Fp + F, :E].set(weights[:, F:, :].astype(jnp.bfloat16))

    grid = (R, Bp // tb, Up // tu)

    # Rough double-buffered VMEM budget; raise the scoped limit only if needed
    # (defaults: v5e 16 MiB, v6e/v7x 32 MiB).
    block_bytes = (2 * (tb * tu * 2 + tu * Fp * 2 + 2 * Fp * Ep * 2
                        + tb * Ep * 4 + tb * 4 + tb * Fp * 2)
                   + tb * Fp * 4)
    cp_kwargs = dict(dimension_semantics=("parallel", "parallel", "arbitrary"))
    if block_bytes > 14 * 1024 * 1024:
        cp_kwargs["vmem_limit_bytes"] = min(2 * block_bytes, 100 * 1024 * 1024)

    out = pl.pallas_call(
        intra_agg_kernel,
        out_shape=jax.ShapeDtypeStruct((R, Bp, Ep), out_dtype),
        grid=grid,
        in_specs=[
            pl.BlockSpec((1, tb, tu), lambda r, b, u: (r, b, u)),      # mask
            pl.BlockSpec((1, tu, Fp), lambda r, b, u: (r, u, 0)),      # embed
            pl.BlockSpec((tb, Fp), lambda r, b, u: (b, 0)),            # self
            pl.BlockSpec((1, tb, 1), lambda r, b, u: (r, b, 0)),       # 1/count
            pl.BlockSpec((1, 2 * Fp, Ep), lambda r, b, u: (r, 0, 0)),  # weight
        ],
        out_specs=pl.BlockSpec((1, tb, Ep), lambda r, b, u: (r, b, 0)),
        scratch_shapes=[pltpu.VMEM((tb, Fp), jnp.float32)],
        compiler_params=pltpu.CompilerParams(**cp_kwargs),
    )(masks_bf, embeds_p, self_p, inv_counts, w_p)
    # TODO(synk): let the consumer eat padded (Bp, Ep) to skip this slice copy.
    return out[:, :B, :E]


def intra_agg_forward(mask, embed_matrix, self_feats, weight):
    """Single-relation convenience wrapper (matches the PyTorch forward).

    `mask` is the BINARY membership matrix; mean normalization is applied
    inside the kernel wrapper (mathematically identical to the module)."""
    out = intra_agg_forward_batched(mask[None], embed_matrix[None],
                                    self_feats, weight[None])
    return out[0]


if __name__ == "__main__":
    num_nodes, feat_dim, embed_dim = 64, 32, 32
    batch, num_relations = 8, 3

    key = jax.random.PRNGKey(0)
    k_feat, k_w, k_r = jax.random.split(key, 3)

    # node feature table (stands in for the `features` embedding module)
    features = jax.random.normal(k_feat, (num_nodes, feat_dim), jnp.float32)

    # per-relation weights: xavier_uniform_ on shape (2*feat_dim, embed_dim)
    bound = float(np.sqrt(6.0 / (2 * feat_dim + embed_dim)))
    weights = jax.random.uniform(
        k_w, (num_relations, 2 * feat_dim, embed_dim), jnp.float32,
        minval=-bound, maxval=bound)

    # r: init.normal_ on (1, feat_dim) -- defined in __init__ but unused in
    # forward(); kept only for parameter-shape parity.
    r_param = jax.random.normal(k_r, (1, feat_dim), jnp.float32)

    # ---- graph glue (host-side, as in the PyTorch module) -------------------
    rng = np.random.RandomState(0)
    nodes = [int(n) for n in rng.choice(num_nodes, size=batch, replace=False)]
    feats_np = np.asarray(features)

    per_rel = []
    U_max = 1
    for _ in range(num_relations):
        to_neighs_list = [
            [int(n) for n in rng.choice(num_nodes, size=int(rng.randint(2, 6)),
                                        replace=False)]
            for _ in range(batch)
        ]
        samp_neighs = [set(x) for x in to_neighs_list]
        unique_nodes_list = list(set.union(*samp_neighs))
        unique_nodes = {n: i for i, n in enumerate(unique_nodes_list)}
        U = len(unique_nodes_list)
        m = np.zeros((batch, U), np.float32)          # BINARY membership
        for i, sn in enumerate(samp_neighs):
            for n in sn:
                m[i, unique_nodes[n]] = 1.0
        per_rel.append((m, unique_nodes_list))
        U_max = max(U_max, U)

    # Stack relations on a common U bucket (zero pad is exact for binary mask).
    masks_np = np.zeros((num_relations, batch, U_max), np.float32)
    embeds_np = np.zeros((num_relations, U_max, feat_dim), np.float32)
    for rel, (m, unl) in enumerate(per_rel):
        U = m.shape[1]
        masks_np[rel, :, :U] = m
        embeds_np[rel, :U, :] = feats_np[np.asarray(unl, dtype=np.int64)]

    self_feats = features[jnp.asarray(nodes, dtype=jnp.int32)]    # (B, F)
    masks = jnp.asarray(masks_np)                                 # binary
    embed_matrices = jnp.asarray(embeds_np)

    # ---- run the Pallas kernel (one gridded call for all relations) ---------
    to_feats = jax.block_until_ready(
        intra_agg_forward_batched(masks, embed_matrices, self_feats, weights))
    assert to_feats.shape == (num_relations, batch, embed_dim)

    # single-relation API parity check (same kernel, grid=(1,1,1))
    single = jax.block_until_ready(
        intra_agg_forward(masks[0], embed_matrices[0], self_feats, weights[0]))

    # ---- reference checks ----------------------------------------------------
    def q_bf16(x):
        # round-trip through bf16 (what the kernel's MXU operands see)
        return np.asarray(jnp.asarray(x).astype(jnp.bfloat16).astype(jnp.float32))

    out_np = np.asarray(to_feats)
    sf_np = np.asarray(self_feats)
    w_np = np.asarray(weights)
    assert np.allclose(np.asarray(single), out_np[0], atol=1e-5, rtol=1e-5)

    for rel in range(num_relations):
        counts = np.maximum(masks_np[rel].sum(1, keepdims=True), 1.0)

        # (a) tight check vs a reference using the kernel's exact quantization
        agg_q = q_bf16((masks_np[rel] @ q_bf16(embeds_np[rel])) / counts)
        cat_q = np.concatenate([q_bf16(sf_np), agg_q], axis=1)
        ref_q = np.maximum(cat_q @ q_bf16(w_np[rel]), 0.0)
        assert np.allclose(out_np[rel], ref_q, atol=1e-2, rtol=1e-2), \
            f"relation {rel}: mismatch vs bf16-quantized reference"

        # (b) loose check vs the exact f32 semantics of the PyTorch module
        ref_f32 = np.maximum(
            np.concatenate(
                [sf_np, (masks_np[rel] / counts) @ embeds_np[rel]], axis=1)
            @ w_np[rel], 0.0)
        assert np.allclose(out_np[rel], ref_f32, atol=1e-1, rtol=1e-1), \
            f"relation {rel}: mismatch vs f32 reference"

    print("KERNEL_OK")
</pallas_src>

<mosaic_0001>
module attributes {stable_mosaic.version = 11 : i64} {
  func.func @intra_agg_kernel(%arg0: i32, %arg1: i32, %arg2: i32, %arg3: memref<1x16x128xbf16, #tpu.memory_space<vmem>>, %arg4: memref<1x128x128xbf16, #tpu.memory_space<vmem>>, %arg5: memref<16x128xbf16, #tpu.memory_space<vmem>>, %arg6: memref<1x16x1xf32, #tpu.memory_space<vmem>>, %arg7: memref<1x256x128xbf16, #tpu.memory_space<vmem>>, %arg8: memref<1x16x128xf32, #tpu.memory_space<vmem>>, %arg9: memref<16x128xf32, #tpu.memory_space<vmem>>) attributes {dimension_semantics = [#tpu.dimension_semantics<parallel>, #tpu.dimension_semantics<parallel>, #tpu.dimension_semantics<arbitrary>], iteration_bounds = array<i64: 3, 1, 1>, scalar_prefetch = 0 : i64, scratch_operands = 1 : i64, tpu.core_type = #tpu.core_type<tc>, window_params = [{transform_indices = @transform_0, window_bounds = array<i64: 1, 16, 128>}, {transform_indices = @transform_1, window_bounds = array<i64: 1, 128, 128>}, {transform_indices = @transform_2, window_bounds = array<i64: 16, 128>}, {transform_indices = @transform_3, window_bounds = array<i64: 1, 16, 1>}, {transform_indices = @transform_4, window_bounds = array<i64: 1, 256, 128>}, {transform_indices = @transform_5, window_bounds = array<i64: 1, 16, 128>}]} {
    %c0_i32 = arith.constant 0 : i32
    %0 = arith.cmpi eq, %arg2, %c0_i32 : i32
    %1 = arith.extui %0 : i1 to i32
    %c0_i32_0 = arith.constant 0 : i32
    %2 = arith.cmpi ne, %1, %c0_i32_0 : i32
    scf.if %2 {
      %cst_12 = arith.constant 0.000000e+00 : f32
      %14 = vector.broadcast %cst_12 : f32 to vector<16x128xf32>
      %c0_13 = arith.constant 0 : index
      %c0_14 = arith.constant 0 : index
      %15 = vector.load %arg9[%c0_13, %c0_14] : memref<16x128xf32, #tpu.memory_space<vmem>>, vector<16x128xf32>
      tpu.vector_store %arg9[%c0_13, %c0_14], %14 {strides = array<i32>} : memref<16x128xf32, #tpu.memory_space<vmem>>, vector<16x128xf32>,
    } else {
    }
    %c0 = arith.constant 0 : index
    %c0_1 = arith.constant 0 : index
    %3 = vector.load %arg9[%c0, %c0_1] : memref<16x128xf32, #tpu.memory_space<vmem>>, vector<16x128xf32>
    %c0_2 = arith.constant 0 : index
    %c0_3 = arith.constant 0 : index
    %c0_4 = arith.constant 0 : index
    %4 = vector.load %arg3[%c0_2, %c0_3, %c0_4] : memref<1x16x128xbf16, #tpu.memory_space<vmem>>, vector<1x16x128xbf16>
    %5 = vector.shape_cast %4 : vector<1x16x128xbf16> to vector<16x128xbf16>
    %c0_5 = arith.constant 0 : index
    %c0_6 = arith.constant 0 : index
    %c0_7 = arith.constant 0 : index
    %6 = vector.load %arg4[%c0_5, %c0_6, %c0_7] : memref<1x128x128xbf16, #tpu.memory_space<vmem>>, vector<1x128x128xbf16>
    %7 = vector.shape_cast %6 : vector<1x128x128xbf16> to vector<128x128xbf16>
    %cst = arith.constant dense<0.000000e+00> : vector<16x128xf32>
    %8 = tpu.matmul %5, %7, %cst {dimension_numbers = #tpu.dot_dimension_numbers<[1], [0], [0], [1], [0, 0, 1, 1], [], []>} : vector<16x128xbf16>, vector<128x128xbf16>, vector<16x128xf32> -> vector<16x128xf32>
    %9 = arith.addf %3, %8 : vector<16x128xf32>
    %c0_8 = arith.constant 0 : index
    %c0_9 = arith.constant 0 : index
    %10 = vector.load %arg9[%c0_8, %c0_9] : memref<16x128xf32, #tpu.memory_space<vmem>>, vector<16x128xf32>
    tpu.vector_store %arg9[%c0_8, %c0_9], %9 {strides = array<i32>} : memref<16x128xf32, #tpu.memory_space<vmem>>, vector<16x128xf32>,
    %c0_i32_10 = arith.constant 0 : i32
    %11 = arith.cmpi eq, %arg2, %c0_i32_10 : i32
    %12 = arith.extui %11 : i1 to i32
    %c0_i32_11 = arith.constant 0 : i32
    %13 = arith.cmpi ne, %12, %c0_i32_11 : i32
    scf.if %13 {
      %c0_12 = arith.constant 0 : index
      %c0_13 = arith.constant 0 : index
      %14 = vector.load %arg9[%c0_12, %c0_13] : memref<16x128xf32, #tpu.memory_space<vmem>>, vector<16x128xf32>
      %c0_14 = arith.constant 0 : index
      %c0_15 = arith.constant 0 : index
      %c0_16 = arith.constant 0 : index
      %15 = vector.load %arg6[%c0_14, %c0_15, %c0_16] : memref<1x16x1xf32, #tpu.memory_space<vmem>>, vector<1x16x1xf32>
      %16 = vector.shape_cast %15 : vector<1x16x1xf32> to vector<16x1xf32>
      %17 = vector.broadcast %16 : vector<16x1xf32> to vector<16x128xf32>
      %18 = arith.mulf %14, %17 : vector<16x128xf32>
      %19 = arith.truncf %18 : vector<16x128xf32> to vector<16x128xbf16>
      %c0_17 = arith.constant 0 : index
      %c0_18 = arith.constant 0 : index
      %20 = vector.load %arg5[%c0_17, %c0_18] : memref<16x128xbf16, #tpu.memory_space<vmem>>, vector<16x128xbf16>
      %21 = tpu.concatenate %20, %19 in 1 : vector<16x128xbf16>, vector<16x128xbf16> -> vector<16x256xbf16>
      %c0_19 = arith.constant 0 : index
      %c0_20 = arith.constant 0 : index
      %c0_21 = arith.constant 0 : index
      %22 = vector.load %arg7[%c0_19, %c0_20, %c0_21] : memref<1x256x128xbf16, #tpu.memory_space<vmem>>, vector<1x256x128xbf16>
      %23 = vector.shape_cast %22 : vector<1x256x128xbf16> to vector<256x128xbf16>
      %cst_22 = arith.constant dense<0.000000e+00> : vector<16x128xf32>
      %24 = tpu.matmul %21, %23, %cst_22 {dimension_numbers = #tpu.dot_dimension_numbers<[1], [0], [0], [1], [0, 0, 1, 1], [], []>} : vector<16x256xbf16>, vector<256x128xbf16>, vector<16x128xf32> -> vector<16x128xf32>
      %cst_23 = arith.constant 0.000000e+00 : f32
      %25 = vector.broadcast %cst_23 : f32 to vector<16x128xf32>
      %26 = arith.maximumf %24, %25 : vector<16x128xf32>
      %c0_24 = arith.constant 0 : index
      %c0_25 = arith.constant 0 : index
      %c0_26 = arith.constant 0 : index
      %27 = vector.load %arg8[%c0_24, %c0_25, %c0_26] : memref<1x16x128xf32, #tpu.memory_space<vmem>>, vector<1x16x128xf32>
      %28 = vector.shape_cast %27 : vector<1x16x128xf32> to vector<16x128xf32>
      %29 = vector.shape_cast %26 : vector<16x128xf32> to vector<1x16x128xf32>
      tpu.vector_store %arg8[%c0_24, %c0_25, %c0_26], %29 {strides = array<i32>} : memref<1x16x128xf32, #tpu.memory_space<vmem>>, vector<1x16x128xf32>,
    } else {
    }
    return
  }
  func.func @transform_0(%arg0: i32, %arg1: i32, %arg2: i32) -> (i32, i32, i32) {
    %c0_i32 = arith.constant 0 : i32
    return %arg0, %arg1, %arg2 : i32, i32, i32
  }
  func.func @transform_1(%arg0: i32, %arg1: i32, %arg2: i32) -> (i32, i32, i32) {
    %c0_i32 = arith.constant 0 : i32
    %c0_i32_0 = arith.constant 0 : i32
    return %arg0, %arg2, %c0_i32 : i32, i32, i32
  }
  func.func @transform_2(%arg0: i32, %arg1: i32, %arg2: i32) -> (i32, i32) {
    %c0_i32 = arith.constant 0 : i32
    %c0_i32_0 = arith.constant 0 : i32
    return %arg1, %c0_i32 : i32, i32
  }
  func.func @transform_3(%arg0: i32, %arg1: i32, %arg2: i32) -> (i32, i32, i32) {
    %c0_i32 = arith.constant 0 : i32
    %c0_i32_0 = arith.constant 0 : i32
    return %arg0, %arg1, %c0_i32 : i32, i32, i32
  }
  func.func @transform_4(%arg0: i32, %arg1: i32, %arg2: i32) -> (i32, i32, i32) {
    %c0_i32 = arith.constant 0 : i32
    %c0_i32_0 = arith.constant 0 : i32
    %c0_i32_1 = arith.constant 0 : i32
    return %arg0, %c0_i32, %c0_i32_0 : i32, i32, i32
  }
  func.func @transform_5(%arg0: i32, %arg1: i32, %arg2: i32) -> (i32, i32, i32) {
    %c0_i32 = arith.constant 0 : i32
    %c0_i32_0 = arith.constant 0 : i32
    return %arg0, %arg1, %c0_i32 : i32, i32, i32
  }
}

</mosaic_0001>

<bundles_post_ra>
// kernel: tpu_custom_call.1
= control target key start
LH: loop header
LB: loop body
LE: loop exit
PB: predicated region body
PF: predicated region fallthrough
CT: control target
= control target key end

     0   :  { %s1498_s0 = inlined_call_operand.vmem [shape: bf16[3,16,128], index: 0, kind: input, shape index: {}]   ;;  %s1499_s1 = inlined_call_operand.hbm [shape: bf16[3,128,128], index: 1, kind: input, shape index: {}]   ;;  %s1500_s2 = inlined_call_operand.vmem [shape: bf16[16,128], index: 2, kind: input, shape index: {}]   ;;  %s1501_s3 = inlined_call_operand.vmem [shape: f32[3,16,1], index: 3, kind: input, shape index: {}]   ;;  %s1502_s4 = inlined_call_operand.hbm [shape: bf16[3,256,128], index: 4, kind: input, shape index: {}]   ;;  %s1503_s5 = inlined_call_operand.hbm [shape: f32[3,16,128], index: 5, kind: output, shape index: {}]  }
   0x1   :  { %1506 = sst [smem:[#allocation14_spill]] %s1499_s1 }
   0x2   :  { %10 = vsyncpa [#allocation4], 0 }
   0x3   :  { %12 = vsyncpa [#allocation4 + $0x1], 0 }
   0x4   :  { %13 = vsyncpa [#allocation7], 0 }
   0x5   :  { %15 = vsyncpa [#allocation7 + $0x1], 0 }
   0x6   :  { %16 = vsyncpa [#allocation5], 0 }
   0x7   :  { %18 = vsyncpa [#allocation5 + $0x1], 0  ;;  %s1312_s18 = smov 0   ;;  %s1314_s19 = smov 0  }
   0x8   :  { %s1316_s20 = smov 0   ;;  %s1318_s21 = smov 0  }
   0x9   :  { %s1320_s22 = smov 0   ;;  %s1322_s23 = smov 0  }
   0xa LB: > { %1507 = sst [smem:[#allocation12_spill]] %s1271_s22  ;;  %s897_s24 = sadd.s32 4294967295, %s1275_s23   ;;  %s1275_s23 = sphi %s1322_s23, %s24_s23   ;;  %s1271_s22 = sphi %s1320_s22, %s1516_s22   ;;  %s1267_s21 = sphi %s1318_s21, %s1515_s21   ;;  %s1263_s20 = sphi %s1316_s20, %s1519_s20   ;;  %s1259_s19 = sphi %s1314_s19, %s1518_s19   ;;  %s1255_s18 = sphi %s1312_s18, %s1517_s18  }
   0xb   : > { %s898_s25 = sadd.s32 4294967294, %s1275_s23   ;;  %s43_s26 = sadd.s32 1, %s1271_s22 }
   0xc   : > { %s82_s27 = sadd.s32 1, %s1263_s20  ;;  %p45_p0 = scmp.ge.s32.totalorder %s43_s26, 3 }
   0xd   : > { %p89_p1 = scmp.ne.s32.totalorder %s1263_s20, %s1259_s19  ;;  %p90_p2 = scmp.eq.s32.totalorder %s1275_s23, 0 }
   0xe   : > { %p95_p3 = scmp.ne.s32.totalorder %s1259_s19, %s1255_s18  ;;  %s1521_s26 = smov (%p45_p0, %s43_s26), 0 }
   0xf   : > { %1508 = sst [smem:[#allocation13_spill]] %s1521_s26  ;;  %p1353_p4 = por %p90_p2, %p89_p1 }
  0x10   : > { %p96_p5 = scmp.eq.s32.totalorder %s897_s24, 0  ;;  %s77_s29 = ssub.s32 %s1271_s22, %s1521_s26 }
  0x11   : > { %p201_p6 = scmp.eq.s32.totalorder %s897_s24, 2  ;;  %p80_p7 = scmp.eq.s32.totalorder %s77_s29, 0 }
  0x12   : > { %p1359_p8 = por %p96_p5, %p95_p3  ;;  %p207_p10 = scmp.eq.s32.totalorder %s898_s25, 2 }
  0x13   : > { %p1363_p9 = por %p201_p6, %p89_p1  ;;  %p1073_p12 = scmp.lt.s32.totalorder %s1275_s23, 3 }
  0x14   : > { %s1368_s7 = scalar_select %p80_p7, %s1263_s20, %s82_s27  }
  0x15   : > { %p1370_p11 = por %p207_p10, %p95_p3  ;;  %s1376_s9 = sand.u32 1, %s1263_s20  }
  0x16   : > { %s902_s10 = sshll.u32 %s1376_s9, 6  ;;  %s1025_s11 = sshll.u32 %s1271_s22, 6 }
  0x17   : > { %s1513_s1 = sld [smem:[#allocation14_spill]]  ;;  %s256_s15 = scalar_lea.vmem [#allocation3], %s902_s10 }
  0x18   : > { %s266_s16 = sshll.u32 %s256_s15, 4  ;;  %p1385_p13 = pnand %p1073_p12, %p1353_p4  ;;  %s267_s16 = int_to_ptr.vmem [resolvable:$true] %s266_s16 }
  0x19   : > { %p908_p0 = scmp.ge.s32.totalorder %s1275_s23, 1  ;;  %s253_s25 = scalar_lea.sflag [#allocation4], %s1376_s9 }
  0x1a   : > { %s1277_s27 = smov 64   ;;  %s1278_s29 = smov 4  }
  0x1b   : > { %p309_p1 = scmp.lt.s32.totalorder %s1275_s23, 4  ;;  %s905_s10 = sshll.u32 %s1376_s9, 7 }
  0x1c   : > { %s290_s26 = scalar_lea.sflag [#allocation7], %s1376_s9 }
  0x1d   : > { %s263_s14 = scalar_lea.hbm %s1513_s1, %s1025_s11  ;;  %s1026_s11 = sshll.u32 %s1271_s22, 7 }
  0x1e   : > { %s264_s17 = sshll.u32 %s263_s14, 4  ;;  %p310_p2 = pnand %p908_p0, %p309_p1  ;;  %s265_s17 = int_to_ptr.hbm [resolvable:$true] %s264_s17 }
  0x1f   : > { %1065 = dma.hbm_to_vmem [thread:$0]  (!%p1385_p13), %s265_s17, 1024, %s267_s16, %s253_s25, %s1277_s27, %s1277_s27, %s1278_s29  }
  0x20   : > { %s298_s28 = scalar_lea.hbm %s1502_s4, %s1026_s11  ;;  %s293_s14 = scalar_lea.vmem [#allocation6], %s905_s10 }
  0x21   : > { %s301_s15 = sshll.u32 %s293_s14, 4  ;;  %s299_s1 = sshll.u32 %s298_s28, 4  ;;  %s302_s15 = int_to_ptr.vmem [resolvable:$true] %s301_s15  ;;  %s300_s1 = int_to_ptr.hbm [resolvable:$true] %s299_s1 }
  0x22   : > { %1068 = dma.hbm_to_vmem [thread:$0]  (!%p1385_p13), %s300_s1, 2048, %s302_s15, %s290_s26, %s1277_s27, %s1277_s27, %s1278_s29  }
  0x23   : > { %313 = sbr.rel (%p310_p2) target bundleno = 366 (0x16e), region = 40  ;;  %s1403_s16 = sand.u32 (!%p310_p2), 1, %s1259_s19  }
  0x24   : > { %s909_s17 = sshll.u32 (!%p310_p2), %s1403_s16, 6  ;;  %s316_s25 = scalar_lea.sflag (!%p310_p2), [#allocation4], %s1403_s16 }
  0x25   : > { %s1407_s22 = scalar_lea.vmem (!%p310_p2), [#allocation3], %s909_s17 }
  0x28   : > { %1242 = dma.done.wait (%p1359_p8), %s316_s25, 1024  }
  0x29   : > { %1244 = vsyncadd (%p1359_p8), %s316_s25, 4294966272  ;;  %s910_s1 = sshll.u32 %s1403_s16, 7  ;;  %s326_s26 = scalar_lea.sflag [#allocation7], %s1403_s16 }
  0x2a   : > { %s1415_s9 = scalar_lea.vmem [#allocation6], %s910_s1 }
  0x2b   : > { %1246 = dma.done.wait (%p1359_p8), %s326_s26, 2048  }
  0x2c   : > { %1248 = vsyncadd (%p1359_p8), %s326_s26, 4294965248  ;;  %p389_p3 = scmp.lt.s32.totalorder %s1267_s21, 2  ;;  %v1037_v0 = vld [vmem:[%s1407_s22 + $0x38] sm:$0xff]  ;;  %v1036_v1 = vld [vmem:[%s1407_s22 + $0x30] sm:$0xff]  ;;  %v1279_v2 = vmov 0   ;;  %s911_s15 = sshll.u32 %s1403_s16, 4 }
  0x2d   : > { %499 = vmatpush.bf16.msra.mxu0 %v1037_v0  ;;  %1128 = vset.pattern.permute.xlu0 %v1279_v2  ;;  %v1046_v4 = vld [vmem:[%s1415_s9 + $0x38] sm:$0xff]  ;;  %v1045_v6 = vld [vmem:[%s1415_s9 + $0x30] sm:$0xff]  ;;  %v1035_v7 = vld [vmem:[%s1407_s22 + $0x28] sm:$0xff]  ;;  %s1055_s17 = sshll.u32 %s1267_s21, 4  ;;  %s713_s29 = scalar_lea.sflag [#allocation5], %s1403_s16 }
  0x2e   : > { %s1423_s24 = scalar_select %p389_p3, %s1267_s21, 2  ;;  %v1054_v5 = vld [vmem:[%s1415_s9 + $0x78] sm:$0xff]  ;;  %680 = vmatpush.bf16.msra.mxu1 %v1046_v4  ;;  %v1053_v8 = vld [vmem:[%s1415_s9 + $0x70] sm:$0xff]  ;;  %v1044_v10 = vld [vmem:[%s1415_s9 + $0x28] sm:$0xff] }
  0x2f   : > { %694 = vmatpush.bf16.msra.mxu2 %v1054_v5  ;;  %v1034_v11 = vld [vmem:[%s1407_s22 + $0x20] sm:$0xff]  ;;  %v1033_v12 = vld [vmem:[%s1407_s22 + $0x18] sm:$0xff]  ;;  %v1032_v13 = vld [vmem:[%s1407_s22 + $0x10] sm:$0xff]  ;;  %s726_s26 = scalar_lea.hbm %s1503_s5, %s1055_s17  ;;  %s1209_s12 = scalar_lea.hbm %s1503_s5, 48 }
  0x30   : > { %s1028_s27 = sshll.u32 %s1423_s24, 4  ;;  %v1031_v14 = vld [vmem:[%s1407_s22 + $0x8] sm:$0xff]  ;;  %s1027_s11 = sshll.u32 %s1423_s24, 3  ;;  %v1030_v15 = vld [vmem:[%s1407_s22] sm:$0xff]  ;;  %v1042_v20 = vld [vmem:[%s1415_s9 + $0x18] sm:$0xff] }
  0x31   : > { %s416_s30 = scalar_lea.vmem %s1501_s3, %s1028_s27  ;;  %500 = vmatpush.bf16.msra.mxu0 %v1036_v1  ;;  %s399_s28 = scalar_lea.vmem %s1498_s0, %s1027_s11  ;;  %v1052_v17 = vld [vmem:[%s1415_s9 + $0x68] sm:$0xff]  ;;  %v1043_v18 = vld [vmem:[%s1415_s9 + $0x20] sm:$0xff]  ;;  %v1050_v21 = vld [vmem:[%s1415_s9 + $0x58] sm:$0xff] }
  0x32   : > { %v522_v3 = vld [vmem:[%s416_s30] sm:$0xff]  ;;  %v523_v9 = vld [vmem:[%s416_s30 + $0x8] sm:$0xff]  ;;  %681 = vmatpush.bf16.msra.mxu1 %v1045_v6  ;;  %v1041_v22 = vld [vmem:[%s1415_s9 + $0x10] sm:$0xff]  ;;  %s729_s27 = sshll.u32 %s726_s26, 4  ;;  %s730_s27 = int_to_ptr.hbm [resolvable:$true] %s729_s27 }
  0x33   : > { %526 = vperm.xlu0 %1128, %v522_v3   ;;  %695 = vmatpush.bf16.msra.mxu2 %v1053_v8  ;;  %v1029_v16 = vld [vmem:[%s399_s28] sm:$0xff]  ;;  %v1049_v23 = vld [vmem:[%s1415_s9 + $0x50] sm:$0xff]  ;;  %v1040_v24 = vld [vmem:[%s1415_s9 + $0x8] sm:$0xff]  ;;  %s1203_s10 = sshra.s32 %s730_s27, 4  ;;  %s1204_s10 = int_to_ptr.hbm [resolvable:$true] %s1203_s10 }
  0x34   : > { %v1051_v19 = vld [vmem:[%s1415_s9 + $0x60] sm:$0xff]  ;;  %v1048_v25 = vld [vmem:[%s1415_s9 + $0x48] sm:$0xff]  ;;  %s1205_s21 = scalar_lea.hbm %s1204_s10, 16  ;;  %p1210_p7 = scmp.lt.s32.totalorder %s1204_s10, %s1503_s5 }
  0x35   : > { %501 = vmatpush.bf16.msra.mxu0 %v1035_v7  ;;  %v1039_v26 = vld [vmem:[%s1415_s9] sm:$0xff]  ;;  %p1206_p4 = scmp.ne.s32.totalorder %s1204_s10, %s1205_s21  ;;  %p1211_p8 = scmp.lt.s32.totalorder %s1209_s12, %s1205_s21 }
  0x36   : > { %682 = vmatpush.bf16.msra.mxu1 %v1044_v10  ;;  %v1047_v27 = vld [vmem:[%s1415_s9 + $0x40] sm:$0xff]  ;;  %s387_s9 = scalar_lea.vmem [#allocation8], %s911_s15 }
  0x37   : > { %696 = vmatpush.bf16.msra.mxu2 %v1052_v17  ;;  %v1038_v28 = vld [vmem:[%s1500_s2] sm:$0xff]  ;;  %s727_s24 = sshll.u32 %s387_s9, 4  ;;  %p1207_p5 = pnand %p1206_p4, %p1363_p9  ;;  %s728_s24 = int_to_ptr.vmem [resolvable:$true] %s727_s24 }
  0x38   : > { %p1212_p10 = por %p1211_p8, %p1210_p7 }
  0x39   : > { %502 = vmatpush.bf16.msra.mxu0 %v1034_v11  ;;  %p1208_p6 = pneg %p1207_p5 }
  0x3a   : > { %683 = vmatpush.bf16.msra.mxu1 %v1043_v18 }
  0x3b   : > { %531 = vperm.xlu0 %1128, %v523_v9   ;;  %697 = vmatpush.bf16.msra.mxu2 %v1051_v19  ;;  %p1213_p12 = pnand %p1212_p10, %p1208_p6 }
  0x3d   : > { %503 = vmatpush.bf16.msra.mxu0 %v1033_v12 }
  0x3e   : > { %684 = vmatpush.bf16.msra.mxu1 %v1042_v20 }
  0x3f   : > { %698 = vmatpush.bf16.msra.mxu2 %v1050_v21 }
  0x41   : > { %504 = vmatpush.bf16.msra.mxu0 %v1032_v13 }
  0x42   : > { %685 = vmatpush.bf16.msra.mxu1 %v1041_v22 }
  0x43   : > { %699 = vmatpush.bf16.msra.mxu2 %v1049_v23 }
  0x45   : > { %505 = vmatpush.bf16.msra.mxu0 %v1031_v14 }
  0x46   : > { %686 = vmatpush.bf16.msra.mxu1 %v1040_v24 }
  0x47   : > { %700 = vmatpush.bf16.msra.mxu2 %v1048_v25 }
  0x49   : > { %506 = vmatpush.bf16.msra.mxu0 %v1030_v15 }
  0x4a   : > { %687 = vmatpush.bf16.msra.mxu1 %v1039_v26 }
  0x4b   : > { %701 = vmatpush.bf16.msra.mxu2 %v1047_v27 }
  0x4c   : > { %507 = vmatmul.bf16.vlgmr.msra.gmra.mxu0 %v1029_v16 }
  0x4d   : > { %688 = vmatmul.bf16.vlgmr.msra.gmra.mxu1 %v1038_v28 }
  0xa5   : > { %v527_v29 = vpop.permute.xlu0 %526 }
  0xad   : > { %v532_v32 = vpop.permute.xlu0 %531 }
  0xc9   : > { %v508_v30 = vpop.f32.mrf.mxu0 }
  0xca   : > { %v534_v31 = vmul.f32 %v527_v29, %v508_v30  ;;  %v689_v40 = vpop.f32.mrf.mxu1 }
  0xcc   : > { %v536_v34 = vpack.c.bf16 %v534_v31, %v534_v31 }
  0xce   : > { %v548_v37 = vunpack.c.l.b16 %v536_v34 }
  0xd1   : > { %v510_v33 = vpop.f32.mrf.mxu0 }
  0xd2   : > { %v535_v35 = vmul.f32 %v532_v32, %v510_v33  ;;  %v691_v44 = vpop.f32.mrf.mxu1 }
  0xd4   : > { %v537_v36 = vpack.c.bf16 %v535_v35, %v535_v35 }
  0xd6   : > { %v549_v38 = vunpack.c.l.b16 %v537_v36 }
  0xd8   : > { %v550_v39 = vpack.c.b16 %v549_v38, %v548_v37 }
  0xda   : > { %702 = vmatmul.bf16.vlgmr.msra.gmra.mxu2 %v550_v39 }
 0x15d   : > { %v703_v41 = vpop.f32.mrf.mxu2 }
 0x15e   : > { %v704_v42 = vadd.f32 %v703_v41, %v689_v40 }
 0x160   : > { %v708_v43 = vmax.f32 %v704_v42, 0.0 }
 0x162   : > { %710 = vst [vmem:[%s387_s9] sm:$0xff] %v708_v43 }
 0x165   : > { %v705_v45 = vpop.f32.mrf.mxu2 }
 0x166   : > { %v706_v46 = vadd.f32 %v705_v45, %v691_v44 }
 0x168   : > { %v709_v47 = vmax.f32 %v706_v46, 0.0 }
 0x16a   : > { %711 = vst [vmem:[%s387_s9 + $0x8] sm:$0xff] %v709_v47 }
 0x16b   : > { %1216 = shalt.err (!%p1213_p12)
}
 0x16c   : > { %s1280_s16 = smov 128   ;;  %s1281_s22 = smov 8  }
 0x16d   : > { %1060 = dma.vmem_to_hbm [thread:$0]  (%p1363_p9), %s728_s24, 256, %s730_s27, %s713_s29, %s1280_s16, %s1280_s16, %s1281_s22  }
 0x16e PF: > { %p1074_p13 = scmp.ge.s32.totalorder %s1275_s23, 2  ;;  %s744_s14 = sand.u32 1, %s1255_s18  }
 0x16f   : > { %s745_s15 = scalar_lea.sflag [#allocation5], %s744_s14 }
 0x170   : > { %p1070_p0 = pnand %p1074_p13, %p1370_p11 }
 0x172   : > { %p1071_p1 = pneg %p1070_p0 }
 0x174   : > { %1250 = dma.done.wait (%p1071_p1), %s745_s15, 256  }
 0x175   : > { %1252 = vsyncadd (%p1071_p1), %s745_s15, 4294967040  ;;  %s24_s23 = sadd.s32 1, %s1275_s23   ;;  %s1515_s21 = sld [smem:[#allocation12_spill]] }
 0x176   : > { %p21_p2 = scmp.ge.s32.totalorder %s24_s23, 5   ;;  %s1516_s22 = sld [smem:[#allocation13_spill]] }
 0x177   : > { %s1517_s18 = smov %s1259_s19  ;;  %s1518_s19 = smov %s1263_s20 }
 0x178   : > { %s1519_s20 = smov %s1368_s7  ;;  %23 = sbr.rel (!%p21_p2) target bundleno = 10 (0xa), region = 115 }
 0x17d   :  { %751 = vsyncpa [#allocation4], 1 }
 0x17e   :  { %753 = vsyncpa [#allocation4 + $0x1], 1 }
 0x17f   :  { %754 = vsyncpa [#allocation7], 1 }
 0x180   :  { %756 = vsyncpa [#allocation7 + $0x1], 1 }
 0x181   :  { %757 = vsyncpa [#allocation5], 1 }
 0x182   :  { %759 = vsyncpa [#allocation5 + $0x1], 1 }

</bundles_post_ra>
